<compile_context>
chip_gen: v7x
topology: tpu7x:2x2x1
jax: 0.10.0
libtpu: 0.0.40
codegen_flags: <defaults>
</compile_context>

<pallas_src>
import functools

import jax
import jax.numpy as jnp
from jax.experimental import pallas as pl
from jax.experimental.pallas import tpu as pltpu


def _round_up(a, b):
    return ((a + b - 1) // b) * b


def _cdiv(a, b):
    return -(-a // b)


def _make_sage_kernel(f, tk, x_resident):
    """Kernel closure over static feature dim, reduction tile and x-residency."""

    def kernel(xs_ref, adj_ref, xn_ref, ws_ref, wn_ref, o_ref, acc_ref):
        k = pl.program_id(1)
        nk = pl.num_programs(1)

        @pl.when(k == 0)
        def _init():
            acc_ref[...] = jnp.zeros_like(acc_ref)

        # adj streamed as int8/bf16 (0/1 -> exact); upcast right before the MXU.
        adj = adj_ref[...].astype(jnp.bfloat16)                 # (tm, tk)
        if x_resident:
            off = pl.multiple_of(k * tk, tk)
            xk = xn_ref[pl.ds(off, tk), :]                      # (tk, f_pad) bf16
        else:
            xk = xn_ref[...]                                    # (tk, f_pad) bf16
        # Columns 0..f-1 accumulate adj @ x ; column f accumulates deg (ones col).
        acc_ref[...] += jnp.dot(adj, xk, preferred_element_type=jnp.float32)

        @pl.when(k == nk - 1)
        def _finalize():
            acc = acc_ref[...]                                  # (tm, f_pad) f32
            deg = acc[:, f:f + 1]                               # (tm, 1)
            inv = 1.0 / (deg + 1.0)                             # exact; once per row blk
            neigh = acc * inv                                   # scaled deg col hits a
                                                                # zero weight row below
            x_i = xs_ref[...]                                   # (tm, f) f32, exact
            out = jnp.dot(x_i, ws_ref[...], preferred_element_type=jnp.float32)
            out = out + jnp.dot(neigh, wn_ref[...],
                                preferred_element_type=jnp.float32)
            # ReLU in f32, single cast at the store (dropout = identity in eval).
            o_ref[...] = jnp.maximum(out, 0.0).astype(o_ref.dtype)

    return kernel


def sage_en_forward(x, adj, w_proj, *, block_rows=256, block_k=4096,
                    adj_stream_dtype=jnp.int8):
    """Sage_En forward.

    x:      (N, nfeat) float
    adj:    (N, N) dense 0/1 adjacency (the int8/bf16 stream cast is only exact
            because entries are 0/1; weighted adjacencies are not supported).
    w_proj: (nembed, 2*nfeat), laid out like nn.Linear(2*nfeat, nembed).weight
    """
    n, f = x.shape
    e = w_proj.shape[0]
    assert w_proj.shape[1] == 2 * f, "w_proj must be (nembed, 2*nfeat)"
    assert adj.shape == (n, n), "adj must be (N, N)"
    assert block_rows % 128 == 0, "block_rows must be a multiple of 128"

    # ---- tiling plan -------------------------------------------------------
    tm = block_rows
    n_rows_pad = _round_up(n, tm)
    nk = max(1, _cdiv(n_rows_pad, max(block_k, tm)))
    tk = _round_up(_cdiv(n_rows_pad, nk), tm)        # multiple of tm, balanced
    n_pad = nk * tk                                  # multiple of tm and tk

    ep = _round_up(e, 128)                           # lane-dense output
    f_aug = f + 1                                    # extra ones column -> degree
    f_pad = _round_up(f_aug, 128)                    # lane-dense acc / x operand

    # ---- operand prep (XLA-side) ------------------------------------------
    w_proj = w_proj.astype(jnp.float32)
    w_self = jnp.pad(jnp.transpose(w_proj[:, :f]), ((0, 0), (0, ep - e)))         # (f, ep)
    w_neigh = jnp.pad(jnp.transpose(w_proj[:, f:]), ((0, f_pad - f), (0, ep - e)))  # (f_pad, ep)

    x_f32 = x.astype(jnp.float32)
    xs = jnp.pad(x_f32, ((0, n_pad - n), (0, 0)))                                  # (n_pad, f) f32

    ones = jnp.ones((n, 1), jnp.float32)
    x_aug = jnp.concatenate([x_f32, ones], axis=1)                                 # [x | 1]
    x_aug = jnp.pad(x_aug, ((0, n_pad - n), (0, f_pad - f_aug))).astype(jnp.bfloat16)

    # adj padded rows/cols are zero -> contribute nothing to agg or deg.
    adj_p = jnp.pad(adj.astype(jnp.float32), ((0, n_pad - n), (0, n_pad - n)))
    adj_s = adj_p.astype(adj_stream_dtype)           # int8 (v5e/v6e) or bf16 (v7x)

    # ---- VMEM plan ---------------------------------------------------------
    adj_itemsize = jnp.dtype(adj_stream_dtype).itemsize
    x_res_bytes = 2 * n_pad * f_pad * 2              # 2 pipeline buffers, bf16
    x_resident = x_res_bytes <= (16 << 20)

    if x_resident:
        xn_spec = pl.BlockSpec((n_pad, f_pad), lambda i, k: (0, 0))
        bytes_xn = x_res_bytes
    else:
        xn_spec = pl.BlockSpec((tk, f_pad), lambda i, k: (k, 0))
        bytes_xn = 2 * tk * f_pad * 2

    est = (2 * tm * tk * adj_itemsize          # adj double buffer
           + bytes_xn                          # neighbor x operand
           + 2 * tm * f * 4                    # self-term row block
           + 2 * (f * ep + f_pad * ep) * 4     # resident weights
           + 2 * tm * ep * 4                   # output tile
           + tm * f_pad * 4)                   # accumulator scratch
    # Raise the scoped limit above v5e's 16 MiB default, stay well under v7x's
    # 64 MiB physical.
    vmem_limit = int(min(48 << 20, max(32 << 20, int(est * 1.5))))

    grid = (n_pad // tm, n_pad // tk)

    out = pl.pallas_call(
        _make_sage_kernel(f, tk, x_resident),
        out_shape=jax.ShapeDtypeStruct((n_pad, ep), jnp.float32),
        grid_spec=pltpu.PrefetchScalarGridSpec(
            num_scalar_prefetch=0,
            grid=grid,
            in_specs=[
                pl.BlockSpec((tm, f), lambda i, k: (i, 0)),      # x row block (self term)
                pl.BlockSpec((tm, tk), lambda i, k: (i, k)),     # adj tile (streamed)
                xn_spec,                                         # augmented x (neigh term)
                pl.BlockSpec((f, ep), lambda i, k: (0, 0)),      # W_self (resident)
                pl.BlockSpec((f_pad, ep), lambda i, k: (0, 0)),  # W_neigh (resident)
            ],
            out_specs=pl.BlockSpec((tm, ep), lambda i, k: (i, 0)),
            scratch_shapes=[
                pltpu.VMEM((tm, f_pad), jnp.float32),            # agg + deg accumulator
            ],
        ),
        compiler_params=pltpu.CompilerParams(
            dimension_semantics=("parallel", "arbitrary"),
            vmem_limit_bytes=vmem_limit,
        ),
    )(xs, adj_s, x_aug, w_self, w_neigh)

    # Slice off node padding and the lane-padding of the embedding dim.
    return out[:n, :e]


def _reference(x, adj, w_proj):
    neigh = (adj @ x) / (jnp.sum(adj, axis=1, keepdims=True) + 1.0)
    data = jnp.concatenate([x, neigh], axis=-1)
    return jnp.maximum(data @ w_proj.T, 0.0)


if __name__ == "__main__":
    key = jax.random.PRNGKey(0)
    k_x, k_adj, k_w = jax.random.split(key, 3)

    N, NFEAT, NEMBED = 256, 32, 16

    x = jax.random.normal(k_x, (N, NFEAT), dtype=jnp.float32)
    # symmetric-ish dense adjacency with 0/1 entries, no self loops
    adj_raw = (jax.random.uniform(k_adj, (N, N)) < 0.05).astype(jnp.float32)
    adj = jnp.maximum(adj_raw, adj_raw.T) * (1.0 - jnp.eye(N, dtype=jnp.float32))

    # nn.init.normal_(proj.weight): standard normal, shape (nembed, 2*nfeat)
    w_proj = jax.random.normal(k_w, (NEMBED, 2 * NFEAT), dtype=jnp.float32)

    ref = _reference(x, adj, w_proj)

    # (1) default (large-tile) config: single k block, init+finalize same step.
    out_big = sage_en_forward(x, adj, w_proj)
    jax.block_until_ready(out_big)
    assert out_big.shape == (N, NEMBED)
    err_big = float(jnp.max(jnp.abs(out_big - ref)))
    assert jnp.allclose(out_big, ref, atol=3e-2, rtol=3e-2), \
        f"mismatch vs reference (default tiles, max abs err {err_big})"

    # (2) multi-block config: exercises the k-accumulation and megacore i axis.
    out_small = sage_en_forward(x, adj, w_proj, block_rows=128, block_k=128)
    jax.block_until_ready(out_small)
    err_small = float(jnp.max(jnp.abs(out_small - ref)))
    assert jnp.allclose(out_small, ref, atol=3e-2, rtol=3e-2), \
        f"mismatch vs reference (small tiles, max abs err {err_small})"

    print("KERNEL_OK")
</pallas_src>

<mosaic_0001>
module attributes {stable_mosaic.version = 11 : i64} {
  func.func @kernel(%arg0: i32, %arg1: i32, %arg2: memref<256x32xf32, #tpu.memory_space<vmem>>, %arg3: memref<256x256xi8, #tpu.memory_space<vmem>>, %arg4: memref<256x128xbf16, #tpu.memory_space<vmem>>, %arg5: memref<32x128xf32, #tpu.memory_space<vmem>>, %arg6: memref<128x128xf32, #tpu.memory_space<vmem>>, %arg7: memref<256x128xf32, #tpu.memory_space<vmem>>, %arg8: memref<256x128xf32, #tpu.memory_space<vmem>>) attributes {dimension_semantics = [#tpu.dimension_semantics<parallel>, #tpu.dimension_semantics<arbitrary>], iteration_bounds = array<i64: 1, 1>, scalar_prefetch = 0 : i64, scratch_operands = 1 : i64, tpu.core_type = #tpu.core_type<tc>, window_params = [{transform_indices = @transform_0, window_bounds = array<i64: 256, 32>}, {transform_indices = @transform_1, window_bounds = array<i64: 256, 256>}, {pipeline_mode = #tpu.pipeline_mode<synchronous>, transform_indices = @transform_2, window_bounds = array<i64: 256, 128>}, {pipeline_mode = #tpu.pipeline_mode<synchronous>, transform_indices = @transform_3, window_bounds = array<i64: 32, 128>}, {pipeline_mode = #tpu.pipeline_mode<synchronous>, transform_indices = @transform_4, window_bounds = array<i64: 128, 128>}, {transform_indices = @transform_5, window_bounds = array<i64: 256, 128>}]} {
    %c0_i32 = arith.constant 0 : i32
    %0 = arith.cmpi eq, %arg1, %c0_i32 : i32
    %1 = arith.extui %0 : i1 to i32
    %c0_i32_0 = arith.constant 0 : i32
    %2 = arith.cmpi ne, %1, %c0_i32_0 : i32
    scf.if %2 {
      %cst_9 = arith.constant 0.000000e+00 : f32
      %16 = vector.broadcast %cst_9 : f32 to vector<256x128xf32>
      %c0_10 = arith.constant 0 : index
      %c0_11 = arith.constant 0 : index
      %17 = vector.load %arg8[%c0_10, %c0_11] : memref<256x128xf32, #tpu.memory_space<vmem>>, vector<256x128xf32>
      tpu.vector_store %arg8[%c0_10, %c0_11], %16 {strides = array<i32>} : memref<256x128xf32, #tpu.memory_space<vmem>>, vector<256x128xf32>,
    } else {
    }
    %c0 = arith.constant 0 : index
    %c0_1 = arith.constant 0 : index
    %3 = vector.load %arg3[%c0, %c0_1] : memref<256x256xi8, #tpu.memory_space<vmem>>, vector<256x256xi8>
    %4 = arith.sitofp %3 : vector<256x256xi8> to vector<256x256xbf16>
    %c256_i32 = arith.constant 256 : i32
    %5 = arith.muli %arg1, %c256_i32 : i32
    %6 = tpu.assume_multiple %5, 256 : i32
    %7 = arith.index_cast %6 : i32 to index
    %c0_2 = arith.constant 0 : index
    %8 = vector.load %arg4[%7, %c0_2] : memref<256x128xbf16, #tpu.memory_space<vmem>>, vector<256x128xbf16>
    %c0_3 = arith.constant 0 : index
    %c0_4 = arith.constant 0 : index
    %9 = vector.load %arg8[%c0_3, %c0_4] : memref<256x128xf32, #tpu.memory_space<vmem>>, vector<256x128xf32>
    %cst = arith.constant dense<0.000000e+00> : vector<256x128xf32>
    %10 = tpu.matmul %4, %8, %cst {dimension_numbers = #tpu.dot_dimension_numbers<[1], [0], [0], [1], [0, 0, 1, 1], [], []>} : vector<256x256xbf16>, vector<256x128xbf16>, vector<256x128xf32> -> vector<256x128xf32>
    %11 = arith.addf %9, %10 : vector<256x128xf32>
    %c0_5 = arith.constant 0 : index
    %c0_6 = arith.constant 0 : index
    %12 = vector.load %arg8[%c0_5, %c0_6] : memref<256x128xf32, #tpu.memory_space<vmem>>, vector<256x128xf32>
    tpu.vector_store %arg8[%c0_5, %c0_6], %11 {strides = array<i32>} : memref<256x128xf32, #tpu.memory_space<vmem>>, vector<256x128xf32>,
    %c0_i32_7 = arith.constant 0 : i32
    %13 = arith.cmpi eq, %arg1, %c0_i32_7 : i32
    %14 = arith.extui %13 : i1 to i32
    %c0_i32_8 = arith.constant 0 : i32
    %15 = arith.cmpi ne, %14, %c0_i32_8 : i32
    scf.if %15 {
      %c0_9 = arith.constant 0 : index
      %c0_10 = arith.constant 0 : index
      %16 = vector.load %arg8[%c0_9, %c0_10] : memref<256x128xf32, #tpu.memory_space<vmem>>, vector<256x128xf32>
      %17 = vector.extract_strided_slice %16 {offsets = [0, 32], sizes = [256, 1], strides = [1, 1]} : vector<256x128xf32> to vector<256x1xf32>
      %cst_11 = arith.constant 1.000000e+00 : f32
      %18 = vector.broadcast %cst_11 : f32 to vector<256x1xf32>
      %19 = arith.addf %17, %18 : vector<256x1xf32>
      %cst_12 = arith.constant 1.000000e+00 : f32
      %20 = vector.broadcast %cst_12 : f32 to vector<256x1xf32>
      %21 = arith.divf %20, %19 : vector<256x1xf32>
      %22 = vector.broadcast %21 : vector<256x1xf32> to vector<256x128xf32>
      %23 = arith.mulf %16, %22 : vector<256x128xf32>
      %c0_13 = arith.constant 0 : index
      %c0_14 = arith.constant 0 : index
      %24 = vector.load %arg2[%c0_13, %c0_14] : memref<256x32xf32, #tpu.memory_space<vmem>>, vector<256x32xf32>
      %c0_15 = arith.constant 0 : index
      %c0_16 = arith.constant 0 : index
      %25 = vector.load %arg5[%c0_15, %c0_16] : memref<32x128xf32, #tpu.memory_space<vmem>>, vector<32x128xf32>
      %cst_17 = arith.constant dense<0.000000e+00> : vector<256x128xf32>
      %26 = tpu.matmul %24, %25, %cst_17 {dimension_numbers = #tpu.dot_dimension_numbers<[1], [0], [0], [1], [0, 0, 1, 1], [], []>} : vector<256x32xf32>, vector<32x128xf32>, vector<256x128xf32> -> vector<256x128xf32>
      %c0_18 = arith.constant 0 : index
      %c0_19 = arith.constant 0 : index
      %27 = vector.load %arg6[%c0_18, %c0_19] : memref<128x128xf32, #tpu.memory_space<vmem>>, vector<128x128xf32>
      %cst_20 = arith.constant dense<0.000000e+00> : vector<256x128xf32>
      %28 = tpu.matmul %23, %27, %cst_20 {dimension_numbers = #tpu.dot_dimension_numbers<[1], [0], [0], [1], [0, 0, 1, 1], [], []>} : vector<256x128xf32>, vector<128x128xf32>, vector<256x128xf32> -> vector<256x128xf32>
      %29 = arith.addf %26, %28 : vector<256x128xf32>
      %cst_21 = arith.constant 0.000000e+00 : f32
      %30 = vector.broadcast %cst_21 : f32 to vector<256x128xf32>
      %31 = arith.maximumf %29, %30 : vector<256x128xf32>
      %c0_22 = arith.constant 0 : index
      %c0_23 = arith.constant 0 : index
      %32 = vector.load %arg7[%c0_22, %c0_23] : memref<256x128xf32, #tpu.memory_space<vmem>>, vector<256x128xf32>
      tpu.vector_store %arg7[%c0_22, %c0_23], %31 {strides = array<i32>} : memref<256x128xf32, #tpu.memory_space<vmem>>, vector<256x128xf32>,
    } else {
    }
    return
  }
  func.func @transform_0(%arg0: i32, %arg1: i32) -> (i32, i32) {
    %c0_i32 = arith.constant 0 : i32
    %c0_i32_0 = arith.constant 0 : i32
    return %arg0, %c0_i32 : i32, i32
  }
  func.func @transform_1(%arg0: i32, %arg1: i32) -> (i32, i32) {
    %c0_i32 = arith.constant 0 : i32
    return %arg0, %arg1 : i32, i32
  }
  func.func @transform_2(%arg0: i32, %arg1: i32) -> (i32, i32) {
    %c0_i32 = arith.constant 0 : i32
    %c0_i32_0 = arith.constant 0 : i32
    %c0_i32_1 = arith.constant 0 : i32
    return %c0_i32, %c0_i32_0 : i32, i32
  }
  func.func @transform_3(%arg0: i32, %arg1: i32) -> (i32, i32) {
    %c0_i32 = arith.constant 0 : i32
    %c0_i32_0 = arith.constant 0 : i32
    %c0_i32_1 = arith.constant 0 : i32
    return %c0_i32, %c0_i32_0 : i32, i32
  }
  func.func @transform_4(%arg0: i32, %arg1: i32) -> (i32, i32) {
    %c0_i32 = arith.constant 0 : i32
    %c0_i32_0 = arith.constant 0 : i32
    %c0_i32_1 = arith.constant 0 : i32
    return %c0_i32, %c0_i32_0 : i32, i32
  }
  func.func @transform_5(%arg0: i32, %arg1: i32) -> (i32, i32) {
    %c0_i32 = arith.constant 0 : i32
    %c0_i32_0 = arith.constant 0 : i32
    return %arg0, %c0_i32 : i32, i32
  }
}

</mosaic_0001>

<bundles_post_ra>
// kernel: tpu_custom_call.1
= control target key start
LH: loop header
LB: loop body
LE: loop exit
PB: predicated region body
PF: predicated region fallthrough
CT: control target
= control target key end

     0   :  { %10 = vsyncpa [#allocation4], 0  ;;  %s2535_s0 = inlined_call_operand.vmem [shape: f32[256,32], index: 0, kind: input, shape index: {}]   ;;  %s2536_s1 = inlined_call_operand.vmem [shape: s8[256,256], index: 1, kind: input, shape index: {}]   ;;  %s2537_s2 = inlined_call_operand.vmem [shape: bf16[256,128], index: 2, kind: input, shape index: {}]   ;;  %s2538_s3 = inlined_call_operand.vmem [shape: f32[32,128], index: 3, kind: input, shape index: {}]   ;;  %s2539_s4 = inlined_call_operand.hbm [shape: f32[128,128], index: 4, kind: input, shape index: {}]   ;;  %s2540_s5 = inlined_call_operand.hbm [shape: f32[256,128], index: 5, kind: output, shape index: {}]  }
   0x1   :  { %11 = vsyncpa [#allocation5], 0  ;;  %s2102_s18 = smov [#allocation3]   ;;  %s2054_s22 = scalar_lea.hbm %s2539_s4, 2048 }
   0x2   :  { %s25_s19 = sshll.u32 %s2102_s18, 4  ;;  %p2055_p0 = scmp.ne.s32.totalorder %s2539_s4, %s2054_s22  ;;  %s26_s19 = int_to_ptr.vmem [resolvable:$true] %s25_s19 }
   0x3   :  { %p2058_p1 = scmp.lt.u32.totalorder %s2054_s22, %s2539_s4 }
   0x5   :  { %p2060_p2 = pnand %p2058_p1, %p2055_p0 }
   0x7   :  { %2063 = shalt.err (!%p2060_p2)
}
   0x8   :  { %s2064_s27 = scalar_lea.vmem %s26_s19, 2048  ;;  %p2069_p4 = scmp.lt.s32.totalorder %s26_s19, %s26_s19 }
   0x9   :  { %p2065_p3 = scmp.ne.s32.totalorder %s26_s19, %s2064_s27  ;;  %p2070_p5 = scmp.lt.s32.totalorder %s2064_s27, %s2064_s27 }
   0xb   :  { %p2071_p6 = por %p2070_p5, %p2069_p4 }
   0xd   :  { %p2072_p7 = pnand %p2071_p6, %p2065_p3 }
   0xf   :  { %2075 = shalt.err (!%p2072_p7)
}
  0x10   :  { %s2103_s28 = smov 128   ;;  %s2104_s29 = smov 8  }
  0x11   :  { %31 = dma.hbm_to_vmem [thread:$0]  %s2539_s4, 2048, %s26_s19, [#allocation4], %s2103_s28, %s2103_s28, %s2104_s29  }
  0x12   :  { %2098 = dma.done.wait [#allocation4], 2048  }
  0x13   :  { %2099 = vsyncadd [#allocation4], 4294965248  ;;  %v1974_v0 = vld [vmem:[%s2537_s2 + $0x40] sm:$0xff]   ;;  %v1976_v2 = vld [vmem:[%s2537_s2 + $0x48] sm:$0xff]   ;;  %v2105_v58 = vmov 32   ;;  %vm1110_vm0 = vcmask 261120  }
  0x14   :  { %v1975_v1 = vld [vmem:[%s2537_s2] sm:$0xff]   ;;  %1563 = vmatprep.subr.bf16.mxu0 %v1974_v0  ;;  %v1977_v3 = vld [vmem:[%s2537_s2 + $0x8] sm:$0xff]   ;;  %v1978_v4 = vld [vmem:[%s2537_s2 + $0x50] sm:$0xff]   ;;  %1972 = vset.pattern.permute.xlu0 %v2105_v58 }
  0x15   :  { %1564 = vmatpush3.bf16.msra.mxu0 %v1975_v1  ;;  %v1979_v5 = vld [vmem:[%s2537_s2 + $0x10] sm:$0xff]   ;;  %v1980_v6 = vld [vmem:[%s2537_s2 + $0x58] sm:$0xff]   ;;  %v1982_v8 = vld [vmem:[%s2537_s2 + $0x60] sm:$0xff]   ;;  %1973 = vset.pattern.permute.xlu1 %v2105_v58 }
  0x16   :  { %1565 = vmatprep.subr.bf16.mxu0 %v1976_v2  ;;  %v1981_v7 = vld [vmem:[%s2537_s2 + $0x18] sm:$0xff]   ;;  %v1983_v9 = vld [vmem:[%s2537_s2 + $0x20] sm:$0xff]   ;;  %v1984_v10 = vld [vmem:[%s2537_s2 + $0x68] sm:$0xff]  }
  0x17   :  { %v73_v11 = vld [vmem:[%s2536_s1 + $0x8] sm:$0xff]  ;;  %v1986_v14 = vld [vmem:[%s2537_s2 + $0x70] sm:$0xff]   ;;  %v1988_v16 = vld [vmem:[%s2537_s2 + $0x78] sm:$0xff]  }
  0x18   :  { %v89_v12 = vunpack.c.l.s8.bf16 %v73_v11  ;;  %v1985_v13 = vld [vmem:[%s2537_s2 + $0x28] sm:$0xff]   ;;  %v1987_v15 = vld [vmem:[%s2537_s2 + $0x30] sm:$0xff]   ;;  %v1989_v17 = vld [vmem:[%s2537_s2 + $0x38] sm:$0xff]   ;;  %v91_v20 = vunpack.c.h.s8.bf16 %v73_v11 }
  0x19   :  { %1566 = vmatpush3.bf16.msra.mxu0 %v1977_v3  ;;  %v72_v18 = vld [vmem:[%s2536_s1] sm:$0xff]  ;;  %v75_v21 = vld [vmem:[%s2536_s1 + $0x18] sm:$0xff]  ;;  %v74_v24 = vld [vmem:[%s2536_s1 + $0x10] sm:$0xff] }
  0x1a   :  { %1567 = vmatprep.subr.bf16.mxu0 %v1978_v4  ;;  %317 = vmatprep.mubr.bf16.mxu0 %v89_v12  ;;  %v88_v19 = vunpack.c.l.s8.bf16 %v72_v18  ;;  %v90_v22 = vunpack.c.h.s8.bf16 %v72_v18  ;;  %v93_v23 = vunpack.c.l.s8.bf16 %v75_v21  ;;  %v92_v25 = vunpack.c.l.s8.bf16 %v74_v24  ;;  %v77_v27 = vld [vmem:[%s2536_s1 + $0x28] sm:$0xff]  ;;  %v76_v30 = vld [vmem:[%s2536_s1 + $0x20] sm:$0xff]  ;;  %v79_v33 = vld [vmem:[%s2536_s1 + $0x38] sm:$0xff] }
  0x1b   :  { %v95_v26 = vunpack.c.h.s8.bf16 %v75_v21  ;;  %v94_v28 = vunpack.c.h.s8.bf16 %v74_v24  ;;  %v97_v29 = vunpack.c.l.s8.bf16 %v77_v27  ;;  %v96_v31 = vunpack.c.l.s8.bf16 %v76_v30  ;;  %v78_v36 = vld [vmem:[%s2536_s1 + $0x30] sm:$0xff]  ;;  %v81_v39 = vld [vmem:[%s2536_s1 + $0x48] sm:$0xff]  ;;  %v80_v42 = vld [vmem:[%s2536_s1 + $0x40] sm:$0xff] }
  0x1c   :  { %v99_v32 = vunpack.c.h.s8.bf16 %v77_v27  ;;  %v98_v34 = vunpack.c.h.s8.bf16 %v76_v30  ;;  %v101_v35 = vunpack.c.l.s8.bf16 %v79_v33  ;;  %v100_v37 = vunpack.c.l.s8.bf16 %v78_v36  ;;  %v83_v45 = vld [vmem:[%s2536_s1 + $0x58] sm:$0xff]  ;;  %v82_v48 = vld [vmem:[%s2536_s1 + $0x50] sm:$0xff]  ;;  %v85_v51 = vld [vmem:[%s2536_s1 + $0x68] sm:$0xff] }
  0x1d   :  { %1568 = vmatpush3.bf16.msra.mxu0 %v1979_v5  ;;  %v103_v38 = vunpack.c.h.s8.bf16 %v79_v33  ;;  %v102_v40 = vunpack.c.h.s8.bf16 %v78_v36  ;;  %v105_v41 = vunpack.c.l.s8.bf16 %v81_v39  ;;  %v104_v43 = vunpack.c.l.s8.bf16 %v80_v42  ;;  %v84_v54 = vld [vmem:[%s2536_s1 + $0x60] sm:$0xff]  ;;  %v87_v57 = vld [vmem:[%s2536_s1 + $0x78] sm:$0xff]  ;;  %v86_v61 = vld [vmem:[%s2536_s1 + $0x70] sm:$0xff] }
  0x1e   :  { %1569 = vmatprep.subr.bf16.mxu0 %v1980_v6  ;;  %v107_v44 = vunpack.c.h.s8.bf16 %v81_v39  ;;  %v106_v46 = vunpack.c.h.s8.bf16 %v80_v42  ;;  %v109_v47 = vunpack.c.l.s8.bf16 %v83_v45  ;;  %v108_v49 = vunpack.c.l.s8.bf16 %v82_v48  ;;  %v869_v1 = vld [vmem:[#allocation3] sm:$0xff]  ;;  %v870_v2 = vld [vmem:[#allocation3 + $0x8] sm:$0xff]  ;;  %v871_v4 = vld [vmem:[#allocation3 + $0x10] sm:$0xff] }
  0x1f   :  { %v111_v50 = vunpack.c.h.s8.bf16 %v83_v45  ;;  %v110_v52 = vunpack.c.h.s8.bf16 %v82_v48  ;;  %v113_v53 = vunpack.c.l.s8.bf16 %v85_v51  ;;  %v112_v55 = vunpack.c.l.s8.bf16 %v84_v54  ;;  %v872_v5 = vld [vmem:[#allocation3 + $0x18] sm:$0xff]  ;;  %v875_v11 = vld [vmem:[#allocation3 + $0x30] sm:$0xff]  ;;  %v877_v18 = vld [vmem:[#allocation3 + $0x40] sm:$0xff] }
  0x20   :  { %v115_v56 = vunpack.c.h.s8.bf16 %v85_v51  ;;  %v114_v59 = vunpack.c.h.s8.bf16 %v84_v54  ;;  %v117_v60 = vunpack.c.l.s8.bf16 %v87_v57  ;;  %v116_v62 = vunpack.c.l.s8.bf16 %v86_v61  ;;  %v876_v12 = vld [vmem:[#allocation3 + $0x38] sm:$0xff]  ;;  %v882_v33 = vld [vmem:[#allocation3 + $0x68] sm:$0xff] }
  0x21   :  { %1570 = vmatpush3.bf16.msra.mxu0 %v1981_v7  ;;  %v119_v63 = vunpack.c.h.s8.bf16 %v87_v57  ;;  %v118_v0 = vunpack.c.h.s8.bf16 %v86_v61  ;;  %v1895_v3 = vpack.c.bf16 %v870_v2, %v869_v1  ;;  %v1899_v6 = vpack.c.bf16 %v872_v5, %v871_v4  ;;  %v873_v7 = vld [vmem:[#allocation3 + $0x20] sm:$0xff] }
  0x22   :  { %1571 = vmatprep.subr.bf16.mxu0 %v1982_v8  ;;  %v874_v8 = vld [vmem:[#allocation3 + $0x28] sm:$0xff] }
  0x23   :  { %1896 = vmatprep.subr.bf16.mxu1 %v1895_v3 }
  0x24   :  { %1898 = vmatpush3.bf16.msra.mxu1 %v1895_v3 }
  0x25   :  { %1572 = vmatpush3.bf16.msra.mxu0 %v1983_v9  ;;  %1900 = vmatprep.subr.bf16.mxu1 %v1899_v6  ;;  %v1903_v9 = vpack.c.bf16 %v874_v8, %v873_v7 }
  0x26   :  { %1573 = vmatprep.subr.bf16.mxu0 %v1984_v10 }
  0x28   :  { %1902 = vmatpush3.bf16.msra.mxu1 %v1899_v6 }
  0x29   :  { %1574 = vmatpush3.bf16.msra.mxu0 %v1985_v13  ;;  %1904 = vmatprep.subr.bf16.mxu1 %v1903_v9 }
  0x2a   :  { %1575 = vmatprep.subr.bf16.mxu0 %v1986_v14  ;;  %v1907_v14 = vpack.c.bf16 %v876_v12, %v875_v11 }
  0x2c   :  { %1906 = vmatpush3.bf16.msra.mxu1 %v1903_v9 }
  0x2d   :  { %1576 = vmatpush3.bf16.msra.mxu0 %v1987_v15  ;;  %1908 = vmatprep.subr.bf16.mxu1 %v1907_v14 }
  0x2e   :  { %1577 = vmatprep.subr.bf16.mxu0 %v1988_v16 }
  0x30   :  { %1910 = vmatpush3.bf16.msra.mxu1 %v1907_v14 }
  0x31   :  { %1578 = vmatpush3.bf16.msra.mxu0 %v1989_v17 }
  0x34   :  { %318 = vmatmul.mubr.bf16.vlgmr.msra.gmra.mrb[0].mxu0 %v88_v19  ;;  %v878_v19 = vld [vmem:[#allocation3 + $0x48] sm:$0xff] }
  0x35   :  { %325 = vmatprep.mubr.bf16.mxu0 %v91_v20 }
  0x3c   :  { %326 = vmatmul.mubr.bf16.gmra.mrb[4].mxu0 %v90_v22  ;;  %v1911_v22 = vpack.c.bf16 %v878_v19, %v877_v18 }
  0x3d   :  { %333 = vmatprep.mubr.bf16.mxu0 %v93_v23 }
  0x3e   :  { %1912 = vmatprep.subr.bf16.mxu1 %v1911_v22 }
  0x3f   :  { %1914 = vmatpush3.bf16.msra.mxu1 %v1911_v22 }
  0x44   :  { %334 = vmatmul.mubr.bf16.gmra.mrb[8].mxu0 %v92_v25  ;;  %v879_v25 = vld [vmem:[#allocation3 + $0x50] sm:$0xff] }
  0x45   :  { %341 = vmatprep.mubr.bf16.mxu0 %v95_v26  ;;  %v880_v26 = vld [vmem:[#allocation3 + $0x58] sm:$0xff] }
  0x4c   :  { %342 = vmatmul.mubr.bf16.gmra.mrb[12].mxu0 %v94_v28  ;;  %v1915_v28 = vpack.c.bf16 %v880_v26, %v879_v25 }
  0x4d   :  { %349 = vmatprep.mubr.bf16.mxu0 %v97_v29 }
  0x4e   :  { %1916 = vmatprep.subr.bf16.mxu1 %v1915_v28 }
  0x4f   :  { %1918 = vmatpush3.bf16.msra.mxu1 %v1915_v28 }
  0x54   :  { %350 = vmatmul.mubr.bf16.gmra.mrb[16].mxu0 %v96_v31 }
  0x55   :  { %357 = vmatprep.mubr.bf16.mxu0 %v99_v32  ;;  %v881_v32 = vld [vmem:[#allocation3 + $0x60] sm:$0xff] }
  0x56   :  { %v1919_v36 = vpack.c.bf16 %v882_v33, %v881_v32 }
  0x58   :  { %1920 = vmatprep.subr.bf16.mxu1 %v1919_v36 }
  0x59   :  { %1922 = vmatpush3.bf16.msra.mxu1 %v1919_v36 }
  0x5c   :  { %358 = vmatmul.mubr.bf16.gmra.mrb[20].mxu0 %v98_v34 }
  0x5d   :  { %365 = vmatprep.mubr.bf16.mxu0 %v101_v35 }
  0x64   :  { %366 = vmatmul.mubr.bf16.gmra.mrb[24].mxu0 %v100_v37 }
  0x65   :  { %373 = vmatprep.mubr.bf16.mxu0 %v103_v38 }
  0x6c   :  { %374 = vmatmul.mubr.bf16.gmra.mrb[28].mxu0 %v102_v40  ;;  %v883_v40 = vld [vmem:[#allocation3 + $0x70] sm:$0xff] }
  0x6d   :  { %381 = vmatprep.mubr.bf16.mxu0 %v105_v41  ;;  %v884_v41 = vld [vmem:[#allocation3 + $0x78] sm:$0xff] }
  0x74   :  { %382 = vmatmul.mubr.bf16.gmra.mrb[32].mxu0 %v104_v43  ;;  %v1923_v43 = vpack.c.bf16 %v884_v41, %v883_v40 }
  0x75   :  { %389 = vmatprep.mubr.bf16.mxu0 %v107_v44 }
  0x76   :  { %1924 = vmatprep.subr.bf16.mxu1 %v1923_v43 }
  0x77   :  { %1926 = vmatpush3.bf16.msra.mxu1 %v1923_v43 }
  0x7c   :  { %390 = vmatmul.mubr.bf16.gmra.mrb[36].mxu0 %v106_v46 }
  0x7d   :  { %397 = vmatprep.mubr.bf16.mxu0 %v109_v47 }
  0x84   :  { %398 = vmatmul.mubr.bf16.gmra.mrb[40].mxu0 %v108_v49 }
  0x85   :  { %405 = vmatprep.mubr.bf16.mxu0 %v111_v50 }
  0x8c   :  { %406 = vmatmul.mubr.bf16.gmra.mrb[44].mxu0 %v110_v52 }
  0x8d   :  { %413 = vmatprep.mubr.bf16.mxu0 %v113_v53 }
  0x94   :  { %414 = vmatmul.mubr.bf16.gmra.mrb[48].mxu0 %v112_v55 }
  0x95   :  { %421 = vmatprep.mubr.bf16.mxu0 %v115_v56 }
  0x9c   :  { %422 = vmatmul.mubr.bf16.gmra.mrb[52].mxu0 %v114_v59 }
  0x9d   :  { %429 = vmatprep.mubr.bf16.mxu0 %v117_v60 }
  0xa4   :  { %430 = vmatmul.mubr.bf16.gmra.mrb[56].mxu0 %v116_v62 }
  0xa5   :  { %437 = vmatprep.mubr.bf16.mxu0 %v119_v63 }
  0xac   :  { %438 = vmatmul.mubr.bf16.gmra.mrb[60].mxu0 %v118_v0 }
 0x107   :  { %v1579_v10 = vpop.f32.mrb[0].mxu0 }
 0x108   :  { %v1580_v13 = vpop.f32.mrb[1].mxu0 }
 0x109   :  { %v2248_v15 = vadd.f32 %v1580_v13, %v1579_v10  ;;  %v1582_v16 = vpop.f32.mrb[2].mxu0 }
 0x10a   :  { %v1583_v17 = vpop.f32.mrb[3].mxu0 }
 0x10b   :  { %v545_v20 = vadd.f32 1.0, %v2248_v15  ;;  %v2251_v21 = vadd.f32 %v1583_v17, %v1582_v16 }
 0x10d   :  { %1990 = vrcp.f32 %v545_v20  ;;  %v546_v23 = vadd.f32 1.0, %v2251_v21 }
 0x10f   :  { %v1585_v24 = vpop.f32.mrb[4].mxu0  ;;  %1992 = vrcp.f32 %v546_v23 }
 0x110   :  { %v1586_v27 = vpop.f32.mrb[5].mxu0 }
 0x111   :  { %v2254_v29 = vadd.f32 %v1586_v27, %v1585_v24  ;;  %v1588_v30 = vpop.f32.mrb[6].mxu0 }
 0x112   :  { %v1589_v31 = vpop.f32.mrb[7].mxu0 }
 0x113   :  { %v547_v34 = vadd.f32 1.0, %v2254_v29  ;;  %v2257_v35 = vadd.f32 %v1589_v31, %v1588_v30 }
 0x115   :  { %1994 = vrcp.f32 %v547_v34  ;;  %v548_v37 = vadd.f32 1.0, %v2257_v35 }
 0x117   :  { %v1991_v38 = vpop.eup %1990  ;;  %v1591_v39 = vpop.f32.mrb[8].mxu0  ;;  %1996 = vrcp.f32 %v548_v37 }
 0x118   :  { %v1592_v42 = vpop.f32.mrb[9].mxu0  ;;  %643 = vperm.xlu0 %1972, %v1991_v38  }
 0x119   :  { %v2260_v44 = vadd.f32 %v1592_v42, %v1591_v39  ;;  %v1594_v45 = vpop.f32.mrb[10].mxu0  ;;  %v1993_v47 = vpop.eup %1992 }
 0x11a   :  { %v1595_v46 = vpop.f32.mrb[11].mxu0 }
 0x11b   :  { %v549_v48 = vadd.f32 1.0, %v2260_v44  ;;  %v2263_v49 = vadd.f32 %v1595_v46, %v1594_v45 }
 0x11c   :  { %648 = vperm.xlu0 %1972, %v1993_v47  }
 0x11d   :  { %1998 = vrcp.f32 %v549_v48  ;;  %v550_v50 = vadd.f32 1.0, %v2263_v49 }
 0x11f   :  { %v1995_v51 = vpop.eup %1994  ;;  %2000 = vrcp.f32 %v550_v50  ;;  %v1597_v52 = vpop.f32.mrb[12].mxu0 }
 0x120   :  { %v1598_v53 = vpop.f32.mrb[13].mxu0  ;;  %653 = vperm.xlu1 %1973, %v1995_v51  }
 0x121   :  { %v2266_v54 = vadd.f32 %v1598_v53, %v1597_v52  ;;  %v1600_v55 = vpop.f32.mrb[14].mxu0  ;;  %v1997_v57 = vpop.eup %1996 }
 0x122   :  { %v1601_v56 = vpop.f32.mrb[15].mxu0 }
 0x123   :  { %v551_v58 = vadd.f32 1.0, %v2266_v54  ;;  %v2269_v59 = vadd.f32 %v1601_v56, %v1600_v55 }
 0x124   :  { %658 = vperm.xlu1 %1973, %v1997_v57  }
 0x125   :  { %2002 = vrcp.f32 %v551_v58  ;;  %v552_v60 = vadd.f32 1.0, %v2269_v59 }
 0x127   :  { %v1999_v61 = vpop.eup %1998  ;;  %2004 = vrcp.f32 %v552_v60  ;;  %v1603_v62 = vpop.f32.mrb[16].mxu0 }
 0x128   :  { %v1604_v63 = vpop.f32.mrb[17].mxu0  ;;  %663 = vperm.xlu0 %1972, %v1999_v61  }
 0x129   :  { %v2001_v0 = vpop.eup %2000  ;;  %v2272_v1 = vadd.f32 %v1604_v63, %v1603_v62  ;;  %v1606_v2 = vpop.f32.mrb[18].mxu0 }
 0x12a   :  { %v1607_v3 = vpop.f32.mrb[19].mxu0  ;;  %668 = vperm.xlu1 %1973, %v2001_v0   ;;  %v865_v0 = vld [vmem:[%s2538_s3] sm:$0xff] }
 0x12b   :  { %v553_v4 = vadd.f32 1.0, %v2272_v1  ;;  %v2275_v5 = vadd.f32 %v1607_v3, %v1606_v2  ;;  %v866_v2 = vld [vmem:[%s2538_s3 + $0x8] sm:$0xff] }
 0x12d   :  { %2006 = vrcp.f32 %v553_v4  ;;  %v554_v6 = vadd.f32 1.0, %v2275_v5  ;;  %v2314_v4 = vpack.c.bf16 %v866_v2, %v865_v0 }
 0x12f   :  { %v2003_v7 = vpop.eup %2002  ;;  %2008 = vrcp.f32 %v554_v6  ;;  %v1609_v8 = vpop.f32.mrb[20].mxu0  ;;  %1928 = vmatprep.subr.bf16.mxu1 %v2314_v4 }
 0x130   :  { %v1610_v9 = vpop.f32.mrb[21].mxu0  ;;  %673 = vperm.xlu0 %1972, %v2003_v7  }
 0x131   :  { %v2005_v10 = vpop.eup %2004  ;;  %v2278_v11 = vadd.f32 %v1610_v9, %v1609_v8  ;;  %v1612_v12 = vpop.f32.mrb[22].mxu0 }
 0x132   :  { %v1613_v13 = vpop.f32.mrb[23].mxu0  ;;  %678 = vperm.xlu1 %1973, %v2005_v10  }
 0x133   :  { %v555_v14 = vadd.f32 1.0, %v2278_v11  ;;  %v2281_v16 = vadd.f32 %v1613_v13, %v1612_v12 }
 0x135   :  { %2010 = vrcp.f32 %v555_v14  ;;  %v556_v17 = vadd.f32 1.0, %v2281_v16 }
 0x137   :  { %v2007_v18 = vpop.eup %2006  ;;  %2012 = vrcp.f32 %v556_v17  ;;  %v1615_v19 = vpop.f32.mrb[24].mxu0 }
 0x138   :  { %v1616_v20 = vpop.f32.mrb[25].mxu0  ;;  %683 = vperm.xlu0 %1972, %v2007_v18  }
 0x139   :  { %v2009_v22 = vpop.eup %2008  ;;  %v2284_v23 = vadd.f32 %v1616_v20, %v1615_v19  ;;  %v1618_v24 = vpop.f32.mrb[26].mxu0 }
 0x13a   :  { %v1619_v25 = vpop.f32.mrb[27].mxu0  ;;  %688 = vperm.xlu1 %1973, %v2009_v22  }
 0x13b   :  { %v557_v26 = vadd.f32 1.0, %v2284_v23  ;;  %v2287_v27 = vadd.f32 %v1619_v25, %v1618_v24 }
 0x13d   :  { %2014 = vrcp.f32 %v557_v26  ;;  %v558_v28 = vadd.f32 1.0, %v2287_v27 }
 0x13f   :  { %v2011_v30 = vpop.eup %2010  ;;  %2016 = vrcp.f32 %v558_v28  ;;  %v1621_v31 = vpop.f32.mrb[28].mxu0 }
 0x140   :  { %v1622_v32 = vpop.f32.mrb[29].mxu0  ;;  %693 = vperm.xlu0 %1972, %v2011_v30  }
 0x141   :  { %v2013_v33 = vpop.eup %2012  ;;  %v2290_v34 = vadd.f32 %v1622_v32, %v1621_v31  ;;  %v1624_v36 = vpop.f32.mrb[30].mxu0 }
 0x142   :  { %v1625_v37 = vpop.f32.mrb[31].mxu0  ;;  %698 = vperm.xlu1 %1973, %v2013_v33  }
 0x143   :  { %v559_v38 = vadd.f32 1.0, %v2290_v34  ;;  %v2293_v39 = vadd.f32 %v1625_v37, %v1624_v36 }
 0x145   :  { %2018 = vrcp.f32 %v559_v38  ;;  %v560_v40 = vadd.f32 1.0, %v2293_v39 }
 0x147   :  { %v2015_v41 = vpop.eup %2014  ;;  %2020 = vrcp.f32 %v560_v40  ;;  %v1627_v42 = vpop.f32.mrb[32].mxu0 }
 0x148   :  { %v1628_v43 = vpop.f32.mrb[33].mxu0  ;;  %703 = vperm.xlu0 %1972, %v2015_v41  }
 0x149   :  { %v2017_v45 = vpop.eup %2016  ;;  %v2296_v46 = vadd.f32 %v1628_v43, %v1627_v42  ;;  %v1630_v47 = vpop.f32.mrb[34].mxu0 }
 0x14a   :  { %v1631_v48 = vpop.f32.mrb[35].mxu0  ;;  %708 = vperm.xlu1 %1973, %v2017_v45  }
 0x14b   :  { %v561_v50 = vadd.f32 1.0, %v2296_v46  ;;  %v2299_v51 = vadd.f32 %v1631_v48, %v1630_v47 }
 0x14d   :  { %2022 = vrcp.f32 %v561_v50  ;;  %v562_v52 = vadd.f32 1.0, %v2299_v51 }
 0x14f   :  { %v2019_v53 = vpop.eup %2018  ;;  %2024 = vrcp.f32 %v562_v52  ;;  %v1633_v55 = vpop.f32.mrb[36].mxu0 }
 0x150   :  { %v1634_v56 = vpop.f32.mrb[37].mxu0  ;;  %713 = vperm.xlu0 %1972, %v2019_v53  }
 0x151   :  { %v2021_v57 = vpop.eup %2020  ;;  %v2302_v58 = vadd.f32 %v1634_v56, %v1633_v55  ;;  %v1636_v60 = vpop.f32.mrb[38].mxu0 }
 0x152   :  { %v1637_v61 = vpop.f32.mrb[39].mxu0  ;;  %718 = vperm.xlu1 %1973, %v2021_v57  }
 0x153   :  { %v563_v62 = vadd.f32 1.0, %v2302_v58  ;;  %v2305_v63 = vadd.f32 %v1637_v61, %v1636_v60 }
 0x155   :  { %2026 = vrcp.f32 %v563_v62  ;;  %v564_v3 = vadd.f32 1.0, %v2305_v63 }
 0x157   :  { %v2023_v6 = vpop.eup %2022  ;;  %2028 = vrcp.f32 %v564_v3  ;;  %v1639_v7 = vpop.f32.mrb[40].mxu0 }
 0x158   :  { %v1640_v8 = vpop.f32.mrb[41].mxu0  ;;  %723 = vperm.xlu0 %1972, %v2023_v6  }
 0x159   :  { %v2025_v9 = vpop.eup %2024  ;;  %v2317_v10 = vadd.f32 %v1640_v8, %v1639_v7  ;;  %v1642_v12 = vpop.f32.mrb[42].mxu0 }
 0x15a   :  { %v1643_v13 = vpop.f32.mrb[43].mxu0  ;;  %728 = vperm.xlu1 %1973, %v2025_v9  }
 0x15b   :  { %v565_v14 = vadd.f32 1.0, %v2317_v10  ;;  %v2320_v17 = vadd.f32 %v1643_v13, %v1642_v12 }
 0x15d   :  { %2030 = vrcp.f32 %v565_v14  ;;  %v566_v18 = vadd.f32 1.0, %v2320_v17 }
 0x15f   :  { %v2027_v19 = vpop.eup %2026  ;;  %2032 = vrcp.f32 %v566_v18  ;;  %v1645_v20 = vpop.f32.mrb[44].mxu0 }
 0x160   :  { %v1646_v22 = vpop.f32.mrb[45].mxu0  ;;  %733 = vperm.xlu0 %1972, %v2027_v19  }
 0x161   :  { %v2029_v24 = vpop.eup %2028  ;;  %v2323_v25 = vadd.f32 %v1646_v22, %v1645_v20  ;;  %v1648_v26 = vpop.f32.mrb[46].mxu0 }
 0x162   :  { %v1649_v28 = vpop.f32.mrb[47].mxu0  ;;  %738 = vperm.xlu1 %1973, %v2029_v24  }
 0x163   :  { %v567_v30 = vadd.f32 1.0, %v2323_v25  ;;  %v2326_v31 = vadd.f32 %v1649_v28, %v1648_v26 }
 0x165   :  { %2034 = vrcp.f32 %v567_v30  ;;  %v568_v32 = vadd.f32 1.0, %v2326_v31 }
 0x167   :  { %v2031_v33 = vpop.eup %2030  ;;  %2036 = vrcp.f32 %v568_v32  ;;  %v1651_v36 = vpop.f32.mrb[48].mxu0 }
 0x168   :  { %v1652_v37 = vpop.f32.mrb[49].mxu0  ;;  %743 = vperm.xlu0 %1972, %v2031_v33  }
 0x169   :  { %v2033_v38 = vpop.eup %2032  ;;  %v2329_v40 = vadd.f32 %v1652_v37, %v1651_v36  ;;  %v1654_v41 = vpop.f32.mrb[50].mxu0 }
 0x16a   :  { %v1655_v42 = vpop.f32.mrb[51].mxu0  ;;  %748 = vperm.xlu1 %1973, %v2033_v38  }
 0x16b   :  { %v569_v43 = vadd.f32 1.0, %v2329_v40  ;;  %v2332_v45 = vadd.f32 %v1655_v42, %v1654_v41 }
 0x16d   :  { %2038 = vrcp.f32 %v569_v43  ;;  %v570_v47 = vadd.f32 1.0, %v2332_v45 }
 0x16f   :  { %v2035_v48 = vpop.eup %2034  ;;  %2040 = vrcp.f32 %v570_v47  ;;  %v1657_v50 = vpop.f32.mrb[52].mxu0  ;;  %v867_v47 = vld [vmem:[%s2538_s3 + $0x10] sm:$0xff] }
 0x170   :  { %v1658_v52 = vpop.f32.mrb[53].mxu0  ;;  %753 = vperm.xlu0 %1972, %v2035_v48   ;;  %v868_v48 = vld [vmem:[%s2538_s3 + $0x18] sm:$0xff] }
 0x171   :  { %v2037_v53 = vpop.eup %2036  ;;  %v2335_v55 = vadd.f32 %v1658_v52, %v1657_v50  ;;  %v1660_v56 = vpop.f32.mrb[54].mxu0 }
 0x172   :  { %v1661_v57 = vpop.f32.mrb[55].mxu0  ;;  %758 = vperm.xlu1 %1973, %v2037_v53   ;;  %v1931_v53 = vpack.c.bf16 %v868_v48, %v867_v47 }
 0x173   :  { %v571_v60 = vadd.f32 1.0, %v2335_v55  ;;  %v2338_v61 = vadd.f32 %v1661_v57, %v1660_v56 }
 0x175   :  { %2042 = vrcp.f32 %v571_v60  ;;  %v572_v62 = vadd.f32 1.0, %v2338_v61 }
 0x177   :  { %v2039_v0 = vpop.eup %2038  ;;  %2044 = vrcp.f32 %v572_v62  ;;  %v1663_v2 = vpop.f32.mrb[56].mxu0 }
 0x178   :  { %v1664_v3 = vpop.f32.mrb[57].mxu0  ;;  %763 = vperm.xlu0 %1972, %v2039_v0  }
 0x179   :  { %v2041_v6 = vpop.eup %2040  ;;  %v2341_v7 = vadd.f32 %v1664_v3, %v1663_v2  ;;  %v1666_v8 = vpop.f32.mrb[58].mxu0 }
 0x17a   :  { %v1667_v9 = vpop.f32.mrb[59].mxu0  ;;  %768 = vperm.xlu1 %1973, %v2041_v6  }
 0x17b   :  { %v573_v12 = vadd.f32 1.0, %v2341_v7  ;;  %v2344_v13 = vadd.f32 %v1667_v9, %v1666_v8 }
 0x17d   :  { %2046 = vrcp.f32 %v573_v12  ;;  %v574_v14 = vadd.f32 1.0, %v2344_v13 }
 0x17f   :  { %v2043_v18 = vpop.eup %2042  ;;  %2048 = vrcp.f32 %v574_v14  ;;  %v1669_v19 = vpop.f32.mrb[60].mxu0 }
 0x180   :  { %v1670_v20 = vpop.f32.mrb[61].mxu0  ;;  %773 = vperm.xlu0 %1972, %v2043_v18  }
 0x181   :  { %v2045_v22 = vpop.eup %2044  ;;  %v2347_v24 = vadd.f32 %v1670_v20, %v1669_v19  ;;  %v1672_v26 = vpop.f32.mrb[62].mxu0 }
 0x182   :  { %v1673_v28 = vpop.f32.mrb[63].mxu0  ;;  %778 = vperm.xlu1 %1973, %v2045_v22  }
 0x183   :  { %v575_v30 = vadd.f32 1.0, %v2347_v24  ;;  %v2350_v32 = vadd.f32 %v1673_v28, %v1672_v26 }
 0x185   :  { %2050 = vrcp.f32 %v575_v30  ;;  %v576_v33 = vadd.f32 1.0, %v2350_v32 }
 0x187   :  { %v2047_v36 = vpop.eup %2046  ;;  %2052 = vrcp.f32 %v576_v33 }
 0x188   :  { %783 = vperm.xlu0 %1972, %v2047_v36  }
 0x189   :  { %v2049_v37 = vpop.eup %2048 }
 0x18a   :  { %788 = vperm.xlu1 %1973, %v2049_v37  }
 0x18f   :  { %v2051_v38 = vpop.eup %2050 }
 0x190   :  { %793 = vperm.xlu0 %1972, %v2051_v38  }
 0x191   :  { %v2053_v41 = vpop.eup %2052 }
 0x192   :  { %798 = vperm.xlu1 %1973, %v2053_v41  }
 0x197   :  { %v644_v42 = vpop.permute.xlu0 %643 }
 0x198   :  { %v801_v43 = vmul.f32 %v2248_v15, %v644_v42 }
 0x19a   :  { %1791 = vmatprep.mubr.f32.mxu1 %v801_v43 }
 0x19b   :  { %v649_v50 = vpop.permute.xlu0 %648 }
 0x19c   :  { %v802_v52 = vmul.f32 %v2251_v21, %v649_v50 }
 0x19e   :  { %1792 = vmatmul.mubr.f32.vlgmr.msra.gmra.mrb[0].mxu1 %v802_v52 }
 0x19f   :  { %v654_v56 = vpop.permute.xlu1 %653  ;;  %1930 = vmatpush3.bf16.msra.mxu1 %v2314_v4 }
 0x1a0   :  { %v803_v57 = vmul.f32 %v2254_v29, %v654_v56  ;;  %1932 = vmatprep.subr.bf16.mxu1 %v1931_v53 }
 0x1a2   :  { %1794 = vmatprep.mubr.f32.mxu1 %v803_v57 }
 0x1a3   :  { %v659_v15 = vpop.permute.xlu1 %658  ;;  %1934 = vmatpush3.bf16.msra.mxu1 %v1931_v53 }
 0x1a4   :  { %v804_v60 = vmul.f32 %v2257_v35, %v659_v15  ;;  %v839_v15 = vld [vmem:[%s2535_s0 + $0x30] sm:$0xff] }
 0x1a6   :  { %1795 = vmatmul.mubr.f32.gmra.mrb[2].mxu1 %v804_v60  ;;  %v840_v60 = vld [vmem:[%s2535_s0 + $0x38] sm:$0xff] }
 0x1a7   :  { %v664_v62 = vpop.permute.xlu0 %663 }
 0x1a8   :  { %v805_v0 = vmul.f32 %v2260_v44, %v664_v62  ;;  %v841_v62 = vld [vmem:[%s2535_s0 + $0x40] sm:$0xff] }
 0x1a9   :  { %v669_v2 = vpop.permute.xlu1 %668 }
 0x1aa   :  { %v806_v21 = vmul.f32 %v2263_v49, %v669_v2  ;;  %1797 = vmatprep.mubr.f32.mxu1 %v805_v0  ;;  %v842_v0 = vld [vmem:[%s2535_s0 + $0x48] sm:$0xff]  ;;  %v843_v2 = vld [vmem:[%s2535_s0 + $0x50] sm:$0xff] }
 0x1ac   :  { %1798 = vmatmul.mubr.f32.gmra.mrb[4].mxu1 %v806_v21  ;;  %v844_v21 = vld [vmem:[%s2535_s0 + $0x58] sm:$0xff] }
 0x1af   :  { %v674_v3 = vpop.permute.xlu0 %673 }
 0x1b0   :  { %v807_v4 = vmul.f32 %v2266_v54, %v674_v3  ;;  %v845_v3 = vld [vmem:[%s2535_s0 + $0x60] sm:$0xff] }
 0x1b1   :  { %v679_v6 = vpop.permute.xlu1 %678 }
 0x1b2   :  { %v808_v29 = vmul.f32 %v2269_v59, %v679_v6  ;;  %1800 = vmatprep.mubr.f32.mxu1 %v807_v4  ;;  %v846_v4 = vld [vmem:[%s2535_s0 + $0x68] sm:$0xff]  ;;  %v847_v6 = vld [vmem:[%s2535_s0 + $0x70] sm:$0xff] }
 0x1b4   :  { %1801 = vmatmul.mubr.f32.gmra.mrb[6].mxu1 %v808_v29  ;;  %v848_v29 = vld [vmem:[%s2535_s0 + $0x78] sm:$0xff] }
 0x1b7   :  { %v684_v8 = vpop.permute.xlu0 %683 }
 0x1b8   :  { %v809_v35 = vmul.f32 %v2272_v1, %v684_v8  ;;  %v849_v8 = vld [vmem:[%s2535_s0 + $0x80] sm:$0xff] }
 0x1b9   :  { %v689_v9 = vpop.permute.xlu1 %688 }
 0x1ba   :  { %v810_v12 = vmul.f32 %v2275_v5, %v689_v9  ;;  %1803 = vmatprep.mubr.f32.mxu1 %v809_v35  ;;  %v850_v35 = vld [vmem:[%s2535_s0 + $0x88] sm:$0xff]  ;;  %v851_v9 = vld [vmem:[%s2535_s0 + $0x90] sm:$0xff] }
 0x1bc   :  { %1804 = vmatmul.mubr.f32.gmra.mrb[8].mxu1 %v810_v12  ;;  %v852_v12 = vld [vmem:[%s2535_s0 + $0x98] sm:$0xff] }
 0x1bf   :  { %v694_v44 = vpop.permute.xlu0 %693 }
 0x1c0   :  { %v811_v49 = vmul.f32 %v2278_v11, %v694_v44  ;;  %v853_v44 = vld [vmem:[%s2535_s0 + $0xa0] sm:$0xff] }
 0x1c1   :  { %v699_v14 = vpop.permute.xlu1 %698 }
 0x1c2   :  { %v812_v18 = vmul.f32 %v2281_v16, %v699_v14  ;;  %1806 = vmatprep.mubr.f32.mxu1 %v811_v49  ;;  %v854_v49 = vld [vmem:[%s2535_s0 + $0xa8] sm:$0xff]  ;;  %v855_v14 = vld [vmem:[%s2535_s0 + $0xb0] sm:$0xff] }
 0x1c4   :  { %1807 = vmatmul.mubr.f32.gmra.mrb[10].mxu1 %v812_v18  ;;  %v856_v18 = vld [vmem:[%s2535_s0 + $0xb8] sm:$0xff] }
 0x1c7   :  { %v704_v54 = vpop.permute.xlu0 %703 }
 0x1c8   :  { %v813_v59 = vmul.f32 %v2284_v23, %v704_v54  ;;  %v857_v54 = vld [vmem:[%s2535_s0 + $0xc0] sm:$0xff] }
 0x1c9   :  { %v709_v19 = vpop.permute.xlu1 %708 }
 0x1ca   :  { %v814_v20 = vmul.f32 %v2287_v27, %v709_v19  ;;  %1809 = vmatprep.mubr.f32.mxu1 %v813_v59  ;;  %v858_v59 = vld [vmem:[%s2535_s0 + $0xc8] sm:$0xff]  ;;  %v859_v19 = vld [vmem:[%s2535_s0 + $0xd0] sm:$0xff] }
 0x1cc   :  { %1810 = vmatmul.mubr.f32.gmra.mrb[12].mxu1 %v814_v20  ;;  %v860_v20 = vld [vmem:[%s2535_s0 + $0xd8] sm:$0xff] }
 0x1cf   :  { %v714_v1 = vpop.permute.xlu0 %713 }
 0x1d0   :  { %v815_v5 = vmul.f32 %v2290_v34, %v714_v1  ;;  %v861_v1 = vld [vmem:[%s2535_s0 + $0xe0] sm:$0xff] }
 0x1d1   :  { %v719_v22 = vpop.permute.xlu1 %718 }
 0x1d2   :  { %v816_v26 = vmul.f32 %v2293_v39, %v719_v22  ;;  %1812 = vmatprep.mubr.f32.mxu1 %v815_v5  ;;  %v862_v5 = vld [vmem:[%s2535_s0 + $0xe8] sm:$0xff]  ;;  %v863_v22 = vld [vmem:[%s2535_s0 + $0xf0] sm:$0xff] }
 0x1d4   :  { %1813 = vmatmul.mubr.f32.gmra.mrb[14].mxu1 %v816_v26  ;;  %v864_v26 = vld [vmem:[%s2535_s0 + $0xf8] sm:$0xff] }
 0x1d7   :  { %v724_v11 = vpop.permute.xlu0 %723 }
 0x1d8   :  { %v817_v16 = vmul.f32 %v2296_v46, %v724_v11 }
 0x1d9   :  { %v729_v28 = vpop.permute.xlu1 %728 }
 0x1da   :  { %v818_v30 = vmul.f32 %v2299_v51, %v729_v28  ;;  %1815 = vmatprep.mubr.f32.mxu1 %v817_v16 }
 0x1dc   :  { %1816 = vmatmul.mubr.f32.gmra.mrb[16].mxu1 %v818_v30 }
 0x1df   :  { %v734_v23 = vpop.permute.xlu0 %733 }
 0x1e0   :  { %v819_v27 = vmul.f32 %v2302_v58, %v734_v23 }
 0x1e1   :  { %v739_v33 = vpop.permute.xlu1 %738 }
 0x1e2   :  { %v820_v36 = vmul.f32 %v2305_v63, %v739_v33  ;;  %1818 = vmatprep.mubr.f32.mxu1 %v819_v27 }
 0x1e4   :  { %1819 = vmatmul.mubr.f32.gmra.mrb[18].mxu1 %v820_v36 }
 0x1e7   :  { %v744_v34 = vpop.permute.xlu0 %743 }
 0x1e8   :  { %v821_v39 = vmul.f32 %v2317_v10, %v744_v34 }
 0x1e9   :  { %v749_v37 = vpop.permute.xlu1 %748 }
 0x1ea   :  { %v822_v38 = vmul.f32 %v2320_v17, %v749_v37  ;;  %1821 = vmatprep.mubr.f32.mxu1 %v821_v39 }
 0x1ec   :  { %1822 = vmatmul.mubr.f32.gmra.mrb[20].mxu1 %v822_v38 }
 0x1ef   :  { %v754_v46 = vpop.permute.xlu0 %753 }
 0x1f0   :  { %v823_v51 = vmul.f32 %v2323_v25, %v754_v46 }
 0x1f1   :  { %v759_v41 = vpop.permute.xlu1 %758 }
 0x1f2   :  { %v824_v42 = vmul.f32 %v2326_v31, %v759_v41  ;;  %1824 = vmatprep.mubr.f32.mxu1 %v823_v51 }
 0x1f4   :  { %1825 = vmatmul.mubr.f32.gmra.mrb[22].mxu1 %v824_v42 }
 0x1f7   :  { %v764_v58 = vpop.permute.xlu0 %763 }
 0x1f8   :  { %v825_v63 = vmul.f32 %v2329_v40, %v764_v58 }
 0x1f9   :  { %v769_v43 = vpop.permute.xlu1 %768 }
 0x1fa   :  { %v826_v47 = vmul.f32 %v2332_v45, %v769_v43  ;;  %1827 = vmatprep.mubr.f32.mxu1 %v825_v63 }
 0x1fc   :  { %1828 = vmatmul.mubr.f32.gmra.mrb[24].mxu1 %v826_v47 }
 0x1ff   :  { %v774_v10 = vpop.permute.xlu0 %773 }
 0x200   :  { %v827_v17 = vmul.f32 %v2335_v55, %v774_v10  ;;  %v833_v55 = vld [vmem:[%s2535_s0] sm:$0xff] }
 0x201   :  { %v779_v48 = vpop.permute.xlu1 %778 }
 0x202   :  { %v828_v50 = vmul.f32 %v2338_v61, %v779_v48  ;;  %1830 = vmatprep.mubr.f32.mxu1 %v827_v17  ;;  %v834_v61 = vld [vmem:[%s2535_s0 + $0x8] sm:$0xff] }
 0x204   :  { %1831 = vmatmul.mubr.f32.gmra.mrb[26].mxu1 %v828_v50 }
 0x207   :  { %v784_v25 = vpop.permute.xlu0 %783 }
 0x208   :  { %v829_v31 = vmul.f32 %v2341_v7, %v784_v25  ;;  %v835_v7 = vld [vmem:[%s2535_s0 + $0x10] sm:$0xff] }
 0x209   :  { %v789_v52 = vpop.permute.xlu1 %788 }
 0x20a   :  { %v830_v53 = vmul.f32 %v2344_v13, %v789_v52  ;;  %1833 = vmatprep.mubr.f32.mxu1 %v829_v31  ;;  %v836_v13 = vld [vmem:[%s2535_s0 + $0x18] sm:$0xff] }
 0x20c   :  { %1834 = vmatmul.mubr.f32.gmra.mrb[28].mxu1 %v830_v53 }
 0x20f   :  { %v794_v40 = vpop.permute.xlu0 %793 }
 0x210   :  { %v831_v45 = vmul.f32 %v2347_v24, %v794_v40  ;;  %v837_v24 = vld [vmem:[%s2535_s0 + $0x20] sm:$0xff] }
 0x211   :  { %v799_v56 = vpop.permute.xlu1 %798 }
 0x212   :  { %v832_v57 = vmul.f32 %v2350_v32, %v799_v56  ;;  %1836 = vmatprep.mubr.f32.mxu1 %v831_v45  ;;  %v838_v32 = vld [vmem:[%s2535_s0 + $0x28] sm:$0xff]  ;;  %s2106_s0 = smov [#allocation6]  }
 0x213   :  { %s1501_s13 = sshll.u32 %s2106_s0, 4  ;;  %s1502_s13 = int_to_ptr.vmem [resolvable:$true] %s1501_s13 }
 0x214   :  { %1837 = vmatmul.mubr.f32.gmra.mrb[30].mxu1 %v832_v57  ;;  %s2076_s14 = scalar_lea.vmem %s1502_s13, 4096  ;;  %p2081_p9 = scmp.lt.s32.totalorder %s1502_s13, %s1502_s13 }
 0x215   :  { %1847 = vmatprep.mubr.msk.f32.mxu1 %vm1110_vm0, %v833_v55  ;;  %p2077_p8 = scmp.ne.s32.totalorder %s1502_s13, %s2076_s14  ;;  %p2082_p10 = scmp.lt.s32.totalorder %s2076_s14, %s2076_s14 }
 0x217   :  { %p2083_p11 = por %p2082_p10, %p2081_p9 }
 0x218   :  { %1848 = vmatmul.mubr.msk.f32.vlgmr.msra.gmra.mrb[0].mxu1 %vm1110_vm0, %v834_v61 }
 0x219   :  { %1850 = vmatprep.mubr.msk.f32.mxu1 %vm1110_vm0, %v835_v7  ;;  %p2084_p12 = pnand %p2083_p11, %p2077_p8 }
 0x21c   :  { %1851 = vmatmul.mubr.msk.f32.gmra.mrb[2].mxu1 %vm1110_vm0, %v836_v13 }
 0x21d   :  { %1853 = vmatprep.mubr.msk.f32.mxu1 %vm1110_vm0, %v837_v24 }
 0x220   :  { %1854 = vmatmul.mubr.msk.f32.gmra.mrb[4].mxu1 %vm1110_vm0, %v838_v32 }
 0x221   :  { %1856 = vmatprep.mubr.msk.f32.mxu1 %vm1110_vm0, %v839_v15 }
 0x224   :  { %1857 = vmatmul.mubr.msk.f32.gmra.mrb[6].mxu1 %vm1110_vm0, %v840_v60 }
 0x225   :  { %1859 = vmatprep.mubr.msk.f32.mxu1 %vm1110_vm0, %v841_v62 }
 0x228   :  { %1860 = vmatmul.mubr.msk.f32.gmra.mrb[8].mxu1 %vm1110_vm0, %v842_v0 }
 0x229   :  { %1862 = vmatprep.mubr.msk.f32.mxu1 %vm1110_vm0, %v843_v2 }
 0x22c   :  { %1863 = vmatmul.mubr.msk.f32.gmra.mrb[10].mxu1 %vm1110_vm0, %v844_v21 }
 0x22d   :  { %1865 = vmatprep.mubr.msk.f32.mxu1 %vm1110_vm0, %v845_v3 }
 0x230   :  { %1866 = vmatmul.mubr.msk.f32.gmra.mrb[12].mxu1 %vm1110_vm0, %v846_v4 }
 0x231   :  { %1868 = vmatprep.mubr.msk.f32.mxu1 %vm1110_vm0, %v847_v6 }
 0x234   :  { %1869 = vmatmul.mubr.msk.f32.gmra.mrb[14].mxu1 %vm1110_vm0, %v848_v29 }
 0x235   :  { %1871 = vmatprep.mubr.msk.f32.mxu1 %vm1110_vm0, %v849_v8 }
 0x238   :  { %1872 = vmatmul.mubr.msk.f32.gmra.mrb[16].mxu1 %vm1110_vm0, %v850_v35 }
 0x239   :  { %1874 = vmatprep.mubr.msk.f32.mxu1 %vm1110_vm0, %v851_v9 }
 0x23c   :  { %1875 = vmatmul.mubr.msk.f32.gmra.mrb[18].mxu1 %vm1110_vm0, %v852_v12 }
 0x23d   :  { %1877 = vmatprep.mubr.msk.f32.mxu1 %vm1110_vm0, %v853_v44 }
 0x240   :  { %1878 = vmatmul.mubr.msk.f32.gmra.mrb[20].mxu1 %vm1110_vm0, %v854_v49 }
 0x241   :  { %1880 = vmatprep.mubr.msk.f32.mxu1 %vm1110_vm0, %v855_v14 }
 0x244   :  { %1881 = vmatmul.mubr.msk.f32.gmra.mrb[22].mxu1 %vm1110_vm0, %v856_v18 }
 0x245   :  { %1883 = vmatprep.mubr.msk.f32.mxu1 %vm1110_vm0, %v857_v54 }
 0x248   :  { %1884 = vmatmul.mubr.msk.f32.gmra.mrb[24].mxu1 %vm1110_vm0, %v858_v59 }
 0x249   :  { %1886 = vmatprep.mubr.msk.f32.mxu1 %vm1110_vm0, %v859_v19 }
 0x24c   :  { %1887 = vmatmul.mubr.msk.f32.gmra.mrb[26].mxu1 %vm1110_vm0, %v860_v20 }
 0x24d   :  { %1889 = vmatprep.mubr.msk.f32.mxu1 %vm1110_vm0, %v861_v1 }
 0x250   :  { %1890 = vmatmul.mubr.msk.f32.gmra.mrb[28].mxu1 %vm1110_vm0, %v862_v5 }
 0x251   :  { %1892 = vmatprep.mubr.msk.f32.mxu1 %vm1110_vm0, %v863_v22 }
 0x254   :  { %1893 = vmatmul.mubr.msk.f32.gmra.mrb[30].mxu1 %vm1110_vm0, %v864_v26 }
 0x2eb   :  { %v1849_v11 = vpop.f32.mrb[0].mxu1 }
 0x2ec   :  { %v1433_v16 = vmax.f32 %v1849_v11, 0.0  ;;  %v1273_v28 = vpop.f32.mrb[1].mxu1 }
 0x2ed   :  { %v1432_v30 = vmax.f32 %v1273_v28, 0.0 }
 0x2ee   :  { %1465 = vst [vmem:[#allocation6 + $0x8] sm:$0xff] %v1433_v16 }
 0x2ef   :  { %1464 = vst [vmem:[#allocation6] sm:$0xff] %v1432_v30  ;;  %v1852_v23 = vpop.f32.mrb[2].mxu1 }
 0x2f0   :  { %v1435_v27 = vmax.f32 %v1852_v23, 0.0  ;;  %v1283_v33 = vpop.f32.mrb[3].mxu1 }
 0x2f1   :  { %v1434_v36 = vmax.f32 %v1283_v33, 0.0 }
 0x2f2   :  { %1467 = vst [vmem:[#allocation6 + $0x18] sm:$0xff] %v1435_v27 }
 0x2f3   :  { %1466 = vst [vmem:[#allocation6 + $0x10] sm:$0xff] %v1434_v36  ;;  %v1855_v34 = vpop.f32.mrb[4].mxu1 }
 0x2f4   :  { %v1437_v39 = vmax.f32 %v1855_v34, 0.0  ;;  %v1293_v37 = vpop.f32.mrb[5].mxu1 }
 0x2f5   :  { %v1436_v38 = vmax.f32 %v1293_v37, 0.0 }
 0x2f6   :  { %1469 = vst [vmem:[#allocation6 + $0x28] sm:$0xff] %v1437_v39 }
 0x2f7   :  { %1468 = vst [vmem:[#allocation6 + $0x20] sm:$0xff] %v1436_v38  ;;  %v1858_v46 = vpop.f32.mrb[6].mxu1 }
 0x2f8   :  { %v1439_v51 = vmax.f32 %v1858_v46, 0.0  ;;  %v1303_v41 = vpop.f32.mrb[7].mxu1 }
 0x2f9   :  { %v1438_v42 = vmax.f32 %v1303_v41, 0.0 }
 0x2fa   :  { %1471 = vst [vmem:[#allocation6 + $0x38] sm:$0xff] %v1439_v51 }
 0x2fb   :  { %1470 = vst [vmem:[#allocation6 + $0x30] sm:$0xff] %v1438_v42  ;;  %v1861_v58 = vpop.f32.mrb[8].mxu1 }
 0x2fc   :  { %v1441_v63 = vmax.f32 %v1861_v58, 0.0  ;;  %v1313_v43 = vpop.f32.mrb[9].mxu1 }
 0x2fd   :  { %v1440_v47 = vmax.f32 %v1313_v43, 0.0 }
 0x2fe   :  { %1473 = vst [vmem:[#allocation6 + $0x48] sm:$0xff] %v1441_v63 }
 0x2ff   :  { %1472 = vst [vmem:[#allocation6 + $0x40] sm:$0xff] %v1440_v47  ;;  %v1864_v10 = vpop.f32.mrb[10].mxu1 }
 0x300   :  { %v1443_v17 = vmax.f32 %v1864_v10, 0.0  ;;  %v1323_v48 = vpop.f32.mrb[11].mxu1 }
 0x301   :  { %v1442_v50 = vmax.f32 %v1323_v48, 0.0 }
 0x302   :  { %1475 = vst [vmem:[#allocation6 + $0x58] sm:$0xff] %v1443_v17 }
 0x303   :  { %1474 = vst [vmem:[#allocation6 + $0x50] sm:$0xff] %v1442_v50  ;;  %v1867_v25 = vpop.f32.mrb[12].mxu1 }
 0x304   :  { %v1445_v31 = vmax.f32 %v1867_v25, 0.0  ;;  %v1333_v52 = vpop.f32.mrb[13].mxu1 }
 0x305   :  { %v1444_v53 = vmax.f32 %v1333_v52, 0.0 }
 0x306   :  { %1477 = vst [vmem:[#allocation6 + $0x68] sm:$0xff] %v1445_v31 }
 0x307   :  { %1476 = vst [vmem:[#allocation6 + $0x60] sm:$0xff] %v1444_v53  ;;  %v1870_v40 = vpop.f32.mrb[14].mxu1 }
 0x308   :  { %v1447_v45 = vmax.f32 %v1870_v40, 0.0  ;;  %v1343_v56 = vpop.f32.mrb[15].mxu1 }
 0x309   :  { %v1446_v57 = vmax.f32 %v1343_v56, 0.0 }
 0x30a   :  { %1479 = vst [vmem:[#allocation6 + $0x78] sm:$0xff] %v1447_v45 }
 0x30b   :  { %1478 = vst [vmem:[#allocation6 + $0x70] sm:$0xff] %v1446_v57  ;;  %v1873_v55 = vpop.f32.mrb[16].mxu1 }
 0x30c   :  { %v1449_v61 = vmax.f32 %v1873_v55, 0.0  ;;  %v1353_v7 = vpop.f32.mrb[17].mxu1 }
 0x30d   :  { %v1448_v13 = vmax.f32 %v1353_v7, 0.0 }
 0x30e   :  { %1481 = vst [vmem:[#allocation6 + $0x88] sm:$0xff] %v1449_v61 }
 0x30f   :  { %1480 = vst [vmem:[#allocation6 + $0x80] sm:$0xff] %v1448_v13  ;;  %v1876_v24 = vpop.f32.mrb[18].mxu1 }
 0x310   :  { %v1451_v32 = vmax.f32 %v1876_v24, 0.0  ;;  %v1363_v15 = vpop.f32.mrb[19].mxu1 }
 0x311   :  { %v1450_v60 = vmax.f32 %v1363_v15, 0.0 }
 0x312   :  { %1483 = vst [vmem:[#allocation6 + $0x98] sm:$0xff] %v1451_v32 }
 0x313   :  { %1482 = vst [vmem:[#allocation6 + $0x90] sm:$0xff] %v1450_v60  ;;  %v1879_v62 = vpop.f32.mrb[20].mxu1 }
 0x314   :  { %v1453_v0 = vmax.f32 %v1879_v62, 0.0  ;;  %v1373_v2 = vpop.f32.mrb[21].mxu1 }
 0x315   :  { %v1452_v21 = vmax.f32 %v1373_v2, 0.0 }
 0x316   :  { %1485 = vst [vmem:[#allocation6 + $0xa8] sm:$0xff] %v1453_v0 }
 0x317   :  { %1484 = vst [vmem:[#allocation6 + $0xa0] sm:$0xff] %v1452_v21  ;;  %v1882_v3 = vpop.f32.mrb[22].mxu1 }
 0x318   :  { %v1455_v4 = vmax.f32 %v1882_v3, 0.0  ;;  %v1383_v6 = vpop.f32.mrb[23].mxu1 }
 0x319   :  { %v1454_v29 = vmax.f32 %v1383_v6, 0.0 }
 0x31a   :  { %1487 = vst [vmem:[#allocation6 + $0xb8] sm:$0xff] %v1455_v4 }
 0x31b   :  { %1486 = vst [vmem:[#allocation6 + $0xb0] sm:$0xff] %v1454_v29  ;;  %v1885_v8 = vpop.f32.mrb[24].mxu1 }
 0x31c   :  { %v1457_v35 = vmax.f32 %v1885_v8, 0.0  ;;  %v1393_v9 = vpop.f32.mrb[25].mxu1 }
 0x31d   :  { %v1456_v12 = vmax.f32 %v1393_v9, 0.0 }
 0x31e   :  { %1489 = vst [vmem:[#allocation6 + $0xc8] sm:$0xff] %v1457_v35 }
 0x31f   :  { %1488 = vst [vmem:[#allocation6 + $0xc0] sm:$0xff] %v1456_v12  ;;  %v1888_v44 = vpop.f32.mrb[26].mxu1 }
 0x320   :  { %v1459_v49 = vmax.f32 %v1888_v44, 0.0  ;;  %v1403_v14 = vpop.f32.mrb[27].mxu1 }
 0x321   :  { %v1458_v18 = vmax.f32 %v1403_v14, 0.0 }
 0x322   :  { %1491 = vst [vmem:[#allocation6 + $0xd8] sm:$0xff] %v1459_v49 }
 0x323   :  { %1490 = vst [vmem:[#allocation6 + $0xd0] sm:$0xff] %v1458_v18  ;;  %v1891_v54 = vpop.f32.mrb[28].mxu1 }
 0x324   :  { %v1461_v59 = vmax.f32 %v1891_v54, 0.0  ;;  %v1413_v19 = vpop.f32.mrb[29].mxu1 }
 0x325   :  { %v1460_v20 = vmax.f32 %v1413_v19, 0.0 }
 0x326   :  { %1493 = vst [vmem:[#allocation6 + $0xe8] sm:$0xff] %v1461_v59 }
 0x327   :  { %1492 = vst [vmem:[#allocation6 + $0xe0] sm:$0xff] %v1460_v20  ;;  %v1894_v1 = vpop.f32.mrb[30].mxu1 }
 0x328   :  { %v1463_v5 = vmax.f32 %v1894_v1, 0.0  ;;  %v1423_v22 = vpop.f32.mrb[31].mxu1 }
 0x329   :  { %v1462_v26 = vmax.f32 %v1423_v22, 0.0 }
 0x32a   :  { %1495 = vst [vmem:[#allocation6 + $0xf8] sm:$0xff] %v1463_v5 }
 0x32b   :  { %1494 = vst [vmem:[#allocation6 + $0xf0] sm:$0xff] %v1462_v26 }
 0x32c   :  { %2087 = shalt.err (!%p2084_p12)
}
 0x32d   :  { %s2088_s16 = scalar_lea.hbm %s2540_s5, 4096 }
 0x32e   :  { %p2089_p13 = scmp.ne.s32.totalorder %s2540_s5, %s2088_s16  ;;  %p2092_p0 = scmp.lt.u32.totalorder %s2088_s16, %s2540_s5 }
 0x330   :  { %p2094_p1 = pnand %p2092_p0, %p2089_p13 }
 0x332   :  { %2097 = shalt.err (!%p2094_p1)
}
 0x333   :  { %1507 = dma.vmem_to_hbm [thread:$0]  %s1502_s13, 4096, %s2540_s5, [#allocation5], %s2103_s28, %s2103_s28, %s2104_s29  }
 0x334   :  { %2100 = dma.done.wait [#allocation5], 4096  }
 0x335   :  { %2101 = vsyncadd [#allocation5], 4294963200 }
 0x336   :  { %1511 = vsyncpa [#allocation4], 1 }
 0x337   :  { %1512 = vsyncpa [#allocation5], 1 }

</bundles_post_ra>
